<compile_context>
chip_gen: v6e
topology: v6e:2x2x1
jax: 0.10.0
libtpu: 0.0.40
codegen_flags: <defaults>
</compile_context>

<pallas_src>
import functools
import math

import jax
import jax.numpy as jnp
from jax import lax
from jax.experimental import pallas as pl
from jax.experimental.pallas import tpu as pltpu


# --------------------------------------------------------------------------- #
# Helpers
# --------------------------------------------------------------------------- #
def _vmem_capacity_bytes() -> int:
    try:
        cap = getattr(pltpu.get_tpu_info(), "vmem_capacity_bytes", None)
        if cap:
            return int(cap)
    except Exception:
        pass
    return 64 << 20  # conservative default: v7x per-TensorCore VMEM


def _vmem_limit_bytes(block_elems: int, itemsize: int, cap: int) -> int:
    # 2x double-buffered input + output, ~4 f32 block-sized temporaries, headroom;
    # never above physical capacity (minus margin).
    est = 4 * block_elems * itemsize + 4 * block_elems * 4 + (8 << 20)
    return int(min(cap - (2 << 20), max(32 << 20, est)))


def _pick_tile(total: int, multiple: int, max_elems: int):
    """Largest legal block extent along one axis: the full `total` (always legal)
    or a power-of-two multiple of `multiple` dividing `total`, <= max_elems."""
    if total <= max_elems:
        return total
    best = None
    c = multiple
    while c <= total and c <= max_elems:
        if total % c == 0:
            best = c
        c *= 2
    return best


def _pick_batch_tile(B: int, per_b_bytes: int, per_buf: int, target: int = 1 << 20) -> int:
    """Merge batch elements into one block until it reaches ~1 MiB (amortizes
    per-grid-step overhead and sub-MiB DMAs for tiny images)."""
    if B == 1 or per_b_bytes >= target:
        return 1
    best = 1
    for d in range(2, B + 1):
        if B % d != 0 or d * per_b_bytes > per_buf:
            continue
        best = d
        if d * per_b_bytes >= target:
            break
    return best


def _lane_group_sum(v, group_stride: int):
    """Sum lanes with equal residue (mod group_stride) along the last axis.

    Every lane j of the result holds the sum over all lanes j' == j (mod
    group_stride), i.e. the per-channel total already broadcast back into the
    channel-interleaved lane layout.  Requires lanes // group_stride to be a
    power of two (guaranteed: lanes = lcm(C, 128)).  Runs on the XLU, which is
    otherwise idle in this kernel.
    """
    lanes = v.shape[-1]
    shift = group_stride
    while shift < lanes:
        v = v + pltpu.roll(v, shift=shift, axis=v.ndim - 1)
        shift *= 2
    return v


# --------------------------------------------------------------------------- #
# Kernels
# --------------------------------------------------------------------------- #
def _inorm_fused_kernel(x_ref, o_ref, *, n: int, group_stride):
    """Single-pass kernel: whole per-(batch, channel-tile) spatial extent resident.

    Two-traversal statistics (numerically safe; the second traversal is free of
    extra HBM traffic because the block is already in VMEM):
        mu  = sum(x) / n
        var = sum((x - mu)^2) / (n - 1)            # torch.std default: unbiased
        out = (x - mu) * min(rsqrt(var), 1e5)      # == (x - mu) / max(sqrt(var), 1e-5)
    """
    xf = x_ref[...].astype(jnp.float32)            # (b_tile, S, lane_tile)
    s1 = jnp.sum(xf, axis=1)                       # (b_tile, lane_tile)
    if group_stride is not None:
        s1 = _lane_group_sum(s1, group_stride)
    mu = s1 / jnp.float32(n)
    d = xf - mu[:, None, :]
    s2 = jnp.sum(d * d, axis=1)
    if group_stride is not None:
        s2 = _lane_group_sum(s2, group_stride)
    var = s2 / jnp.float32(n - 1)
    # EUP rsqrt + VPU multiply instead of sqrt + divide.
    inv_sigma = jnp.minimum(lax.rsqrt(var), jnp.float32(1e5))
    o_ref[...] = (d * inv_sigma[:, None, :]).astype(o_ref.dtype)


def _inorm_stats_kernel(x_ref, stats_ref, s1_acc, s2_acc, *, n: int, group_stride):
    """Two-pass path, pass 1: accumulate per-(b, lane) sum / sum-of-squares over
    spatial tiles ('arbitrary' grid axis), finalize mu / inv_sigma at the end."""
    si = pl.program_id(2)

    @pl.when(si == 0)
    def _():
        s1_acc[...] = jnp.zeros_like(s1_acc)
        s2_acc[...] = jnp.zeros_like(s2_acc)

    xf = x_ref[...].astype(jnp.float32)            # (1, s_tile, lane_tile)
    s1_acc[...] += jnp.sum(xf, axis=1)
    s2_acc[...] += jnp.sum(xf * xf, axis=1)

    @pl.when(si == pl.num_programs(2) - 1)
    def _():
        s1 = s1_acc[...]
        s2 = s2_acc[...]
        if group_stride is not None:
            s1 = _lane_group_sum(s1, group_stride)
            s2 = _lane_group_sum(s2, group_stride)
        nf = jnp.float32(n)
        mu = s1 / nf
        # Streaming one-pass variance; clamp against cancellation.
        # TODO(synk): shifted (pivoted) accumulation would further reduce
        # cancellation when |mean| >> std in the large-image two-pass path.
        var = jnp.maximum((s2 - nf * mu * mu) / jnp.float32(n - 1), 0.0)
        inv_sigma = jnp.minimum(lax.rsqrt(var), jnp.float32(1e5))
        stats_ref[:, 0:1, :] = mu[:, None, :]
        stats_ref[:, 1:2, :] = inv_sigma[:, None, :]


def _inorm_apply_kernel(stats_ref, x_ref, o_ref):
    """Two-pass path, pass 2: elementwise (x - mu) * inv_sigma."""
    mu = stats_ref[:, 0:1, :]
    inv_sigma = stats_ref[:, 1:2, :]
    o_ref[...] = ((x_ref[...].astype(jnp.float32) - mu) * inv_sigma).astype(o_ref.dtype)


# --------------------------------------------------------------------------- #
# Wrapper
# --------------------------------------------------------------------------- #
def instance_norm(t: jax.Array, *, max_block_bytes=None) -> jax.Array:
    """Pallas TPU forward of the PyTorch InstanceNorm module.

    t: (B, D1, D2, C); statistics are taken over dims (1, 2) per (batch, channel),
    exactly like the PyTorch code.  `max_block_bytes` optionally overrides the
    per-block VMEM budget (used in tests to force the spatial-tiled two-pass path).
    """
    B, H, W, C = t.shape
    HW = H * W
    dtype = t.dtype
    itemsize = jnp.dtype(dtype).itemsize
    sub_mult = max(8, 32 // itemsize)             # dtype-aware sublane multiple
    cap = _vmem_capacity_bytes()
    per_buf = (max_block_bytes if max_block_bytes is not None
               else min(8 << 20, max(2 << 20, cap // 16)))

    # ---------------- layout selection (all reshapes are free / contiguous) ----
    if C % 128 == 0:
        # Channels already fill whole vregs: keep them in the lane axis.
        x3 = t.reshape(B, HW, C)
        lanes_total, group_stride, can_tile_lanes = C, None, True
    else:
        L = C * (128 // math.gcd(C, 128))         # lcm(C, 128)
        if (HW * C) % L == 0:
            # Channel-interleaved lane layout: natural HBM order, lane-dense.
            x3 = t.reshape(B, (HW * C) // L, L)
            lanes_total, group_stride, can_tile_lanes = L, C, False
        else:
            # Irregular spatial extent: channels in lanes (lane-sparse for tiny
            # C, but still the minimal 1R + 1W HBM traffic).
            # TODO(synk): pad HW*C up to a multiple of lcm(C, 128) to recover
            # lane density for e.g. C=3 with odd spatial sizes.
            x3 = t.reshape(B, HW, C)
            lanes_total, group_stride, can_tile_lanes = C, None, False
    S = x3.shape[1]

    def _run_fused(lane_tile):
        per_b_bytes = S * lane_tile * itemsize
        b_tile = _pick_batch_tile(B, per_b_bytes, per_buf)
        block = (b_tile, S, lane_tile)
        idx = lambda b, c: (b, 0, c)
        return pl.pallas_call(
            functools.partial(_inorm_fused_kernel, n=HW, group_stride=group_stride),
            out_shape=jax.ShapeDtypeStruct(x3.shape, dtype),
            grid_spec=pltpu.PrefetchScalarGridSpec(
                num_scalar_prefetch=0,
                grid=(B // b_tile, lanes_total // lane_tile),
                in_specs=[pl.BlockSpec(block, idx)],
                out_specs=pl.BlockSpec(block, idx),
            ),
            compiler_params=pltpu.CompilerParams(
                dimension_semantics=("parallel", "parallel"),
                vmem_limit_bytes=_vmem_limit_bytes(b_tile * S * lane_tile, itemsize, cap),
            ),
        )(x3)

    def _run_two_pass(lane_tile, s_tile):
        n_lane = lanes_total // lane_tile
        n_s = S // s_tile
        x_block = (1, s_tile, lane_tile)
        x_idx = lambda b, c, s: (b, s, c)
        st_block = (1, 2, lane_tile)
        st_idx = lambda b, c, s: (b, 0, c)
        vlim = _vmem_limit_bytes(s_tile * lane_tile, itemsize, cap)
        stats = pl.pallas_call(
            functools.partial(_inorm_stats_kernel, n=HW, group_stride=group_stride),
            out_shape=jax.ShapeDtypeStruct((B, 2, lanes_total), jnp.float32),
            grid_spec=pltpu.PrefetchScalarGridSpec(
                num_scalar_prefetch=0,
                grid=(B, n_lane, n_s),
                in_specs=[pl.BlockSpec(x_block, x_idx)],
                out_specs=pl.BlockSpec(st_block, st_idx),
                scratch_shapes=[pltpu.VMEM((1, lane_tile), jnp.float32),
                                pltpu.VMEM((1, lane_tile), jnp.float32)],
            ),
            compiler_params=pltpu.CompilerParams(
                dimension_semantics=("parallel", "parallel", "arbitrary"),
                vmem_limit_bytes=vlim,
            ),
        )(x3)
        return pl.pallas_call(
            _inorm_apply_kernel,
            out_shape=jax.ShapeDtypeStruct(x3.shape, dtype),
            grid_spec=pltpu.PrefetchScalarGridSpec(
                num_scalar_prefetch=0,
                grid=(B, n_lane, n_s),
                in_specs=[pl.BlockSpec(st_block, st_idx),
                          pl.BlockSpec(x_block, x_idx)],
                out_specs=pl.BlockSpec(x_block, x_idx),
            ),
            compiler_params=pltpu.CompilerParams(
                dimension_semantics=("parallel", "parallel", "parallel"),
                vmem_limit_bytes=vlim,
            ),
        )(stats, x3)

    # ---------------- single fused pass if the spatial extent fits VMEM --------
    if can_tile_lanes:
        lane_tile = _pick_tile(lanes_total, 128, per_buf // max(S * itemsize, 1))
    else:
        lane_tile = lanes_total if S * lanes_total * itemsize <= per_buf else None

    if lane_tile is not None:
        out3 = _run_fused(lane_tile)
    else:
        # ---------------- spatial-tiled two-pass (large H*W) -------------------
        if can_tile_lanes:
            lt2 = _pick_tile(lanes_total, 128, per_buf // (sub_mult * itemsize))
            if lt2 is None:
                lt2 = 128 if lanes_total % 128 == 0 else lanes_total
        else:
            lt2 = lanes_total
        s_tile = _pick_tile(S, sub_mult, per_buf // max(lt2 * itemsize, 1))
        if s_tile is None or s_tile == S:
            # No clean spatial tiling available; run one oversized fused block and
            # give the compiler (almost) all of VMEM.
            # TODO(synk): masked partial spatial tiles for irregular extents.
            out3 = _run_fused(lt2)
        else:
            out3 = _run_two_pass(lt2, s_tile)

    return out3.reshape(B, H, W, C)


# --------------------------------------------------------------------------- #
# Reference + tests
# --------------------------------------------------------------------------- #
def _instance_norm_ref(t: jax.Array) -> jax.Array:
    """Pure-JAX reference mirroring the PyTorch code (unbiased std, sigma floor)."""
    t = t.astype(jnp.float32)
    mu = jnp.mean(t, axis=(1, 2), keepdims=True)
    n = t.shape[1] * t.shape[2]
    var = jnp.sum((t - mu) ** 2, axis=(1, 2), keepdims=True) / (n - 1)
    sigma = jnp.maximum(jnp.sqrt(var), 1e-5)
    return (t - mu) / sigma


if __name__ == "__main__":
    key = jax.random.PRNGKey(0)
    k1, k2, k3 = jax.random.split(key, 3)

    # Small-C image (C=4): channel-interleaved lane layout, single fused pass,
    # no transposes anywhere.
    x1 = jax.random.normal(k1, (2, 16, 16, 4), dtype=jnp.float32)
    o1 = jax.block_until_ready(instance_norm(x1))
    r1 = _instance_norm_ref(x1)
    assert o1.shape == x1.shape and o1.dtype == x1.dtype
    assert jnp.allclose(o1, r1, atol=3e-5, rtol=3e-5), (
        f"small-C mismatch, max abs err {jnp.max(jnp.abs(o1 - r1))}")

    # Wide-C (C=128): channels in lanes, batch-tiled single fused pass.
    x2 = jax.random.normal(k2, (2, 8, 8, 128), dtype=jnp.float32)
    o2 = jax.block_until_ready(instance_norm(x2))
    r2 = _instance_norm_ref(x2)
    assert o2.shape == x2.shape and o2.dtype == x2.dtype
    assert jnp.allclose(o2, r2, atol=3e-5, rtol=3e-5), (
        f"wide-C mismatch, max abs err {jnp.max(jnp.abs(o2 - r2))}")

    # Force the spatial-tiled two-pass path (the large-H*W / v7x fallback).
    x3_ = jax.random.normal(k3, (2, 32, 16, 4), dtype=jnp.float32)
    o3 = jax.block_until_ready(instance_norm(x3_, max_block_bytes=4096))
    r3 = _instance_norm_ref(x3_)
    assert o3.shape == x3_.shape and o3.dtype == x3_.dtype
    assert jnp.allclose(o3, r3, atol=3e-5, rtol=3e-5), (
        f"two-pass mismatch, max abs err {jnp.max(jnp.abs(o3 - r3))}")

    print("KERNEL_OK")
</pallas_src>

<mosaic_0001>
module attributes {stable_mosaic.version = 11 : i64} {
  func.func @_inorm_fused_kernel(%arg0: i32, %arg1: i32, %arg2: memref<2x8x128xf32, #tpu.memory_space<vmem>>, %arg3: memref<2x8x128xf32, #tpu.memory_space<vmem>>) attributes {dimension_semantics = [#tpu.dimension_semantics<parallel>, #tpu.dimension_semantics<parallel>], iteration_bounds = array<i64: 1, 1>, scalar_prefetch = 0 : i64, scratch_operands = 0 : i64, tpu.core_type = #tpu.core_type<tc>, window_params = [{transform_indices = @transform_0, window_bounds = array<i64: 2, 8, 128>}, {transform_indices = @transform_1, window_bounds = array<i64: 2, 8, 128>}]} {
    %c0 = arith.constant 0 : index
    %c0_0 = arith.constant 0 : index
    %c0_1 = arith.constant 0 : index
    %0 = vector.load %arg2[%c0, %c0_0, %c0_1] : memref<2x8x128xf32, #tpu.memory_space<vmem>>, vector<2x8x128xf32>
    %cst = arith.constant dense<0.000000e+00> : vector<2x128xf32>
    %1 = vector.multi_reduction <add>, %0, %cst [1] : vector<2x8x128xf32> to vector<2x128xf32>
    %c4_i32 = arith.constant 4 : i32
    %2 = tpu.dynamic_rotate %1 by %c4_i32 dim 1 : vector<2x128xf32>, i32 -> vector<2x128xf32>
    %3 = arith.addf %1, %2 : vector<2x128xf32>
    %c8_i32 = arith.constant 8 : i32
    %4 = tpu.dynamic_rotate %3 by %c8_i32 dim 1 : vector<2x128xf32>, i32 -> vector<2x128xf32>
    %5 = arith.addf %3, %4 : vector<2x128xf32>
    %c16_i32 = arith.constant 16 : i32
    %6 = tpu.dynamic_rotate %5 by %c16_i32 dim 1 : vector<2x128xf32>, i32 -> vector<2x128xf32>
    %7 = arith.addf %5, %6 : vector<2x128xf32>
    %c32_i32 = arith.constant 32 : i32
    %8 = tpu.dynamic_rotate %7 by %c32_i32 dim 1 : vector<2x128xf32>, i32 -> vector<2x128xf32>
    %9 = arith.addf %7, %8 : vector<2x128xf32>
    %c64_i32 = arith.constant 64 : i32
    %10 = tpu.dynamic_rotate %9 by %c64_i32 dim 1 : vector<2x128xf32>, i32 -> vector<2x128xf32>
    %11 = arith.addf %9, %10 : vector<2x128xf32>
    %cst_2 = arith.constant 2.560000e+02 : f32
    %12 = vector.broadcast %cst_2 : f32 to vector<2x128xf32>
    %13 = arith.divf %11, %12 : vector<2x128xf32>
    %14 = vector.shape_cast %13 : vector<2x128xf32> to vector<2x1x128xf32>
    %15 = vector.broadcast %14 : vector<2x1x128xf32> to vector<2x8x128xf32>
    %16 = arith.subf %0, %15 : vector<2x8x128xf32>
    %17 = arith.mulf %16, %16 : vector<2x8x128xf32>
    %cst_3 = arith.constant dense<0.000000e+00> : vector<2x128xf32>
    %18 = vector.multi_reduction <add>, %17, %cst_3 [1] : vector<2x8x128xf32> to vector<2x128xf32>
    %c4_i32_4 = arith.constant 4 : i32
    %19 = tpu.dynamic_rotate %18 by %c4_i32_4 dim 1 : vector<2x128xf32>, i32 -> vector<2x128xf32>
    %20 = arith.addf %18, %19 : vector<2x128xf32>
    %c8_i32_5 = arith.constant 8 : i32
    %21 = tpu.dynamic_rotate %20 by %c8_i32_5 dim 1 : vector<2x128xf32>, i32 -> vector<2x128xf32>
    %22 = arith.addf %20, %21 : vector<2x128xf32>
    %c16_i32_6 = arith.constant 16 : i32
    %23 = tpu.dynamic_rotate %22 by %c16_i32_6 dim 1 : vector<2x128xf32>, i32 -> vector<2x128xf32>
    %24 = arith.addf %22, %23 : vector<2x128xf32>
    %c32_i32_7 = arith.constant 32 : i32
    %25 = tpu.dynamic_rotate %24 by %c32_i32_7 dim 1 : vector<2x128xf32>, i32 -> vector<2x128xf32>
    %26 = arith.addf %24, %25 : vector<2x128xf32>
    %c64_i32_8 = arith.constant 64 : i32
    %27 = tpu.dynamic_rotate %26 by %c64_i32_8 dim 1 : vector<2x128xf32>, i32 -> vector<2x128xf32>
    %28 = arith.addf %26, %27 : vector<2x128xf32>
    %cst_9 = arith.constant 2.550000e+02 : f32
    %29 = vector.broadcast %cst_9 : f32 to vector<2x128xf32>
    %30 = arith.divf %28, %29 : vector<2x128xf32>
    %31 = math.rsqrt %30 : vector<2x128xf32>
    %cst_10 = arith.constant 1.000000e+05 : f32
    %32 = vector.broadcast %cst_10 : f32 to vector<2x128xf32>
    %33 = arith.minimumf %31, %32 : vector<2x128xf32>
    %34 = vector.shape_cast %33 : vector<2x128xf32> to vector<2x1x128xf32>
    %35 = vector.broadcast %34 : vector<2x1x128xf32> to vector<2x8x128xf32>
    %36 = arith.mulf %16, %35 : vector<2x8x128xf32>
    %c0_11 = arith.constant 0 : index
    %c0_12 = arith.constant 0 : index
    %c0_13 = arith.constant 0 : index
    %37 = vector.load %arg3[%c0_11, %c0_12, %c0_13] : memref<2x8x128xf32, #tpu.memory_space<vmem>>, vector<2x8x128xf32>
    tpu.vector_store %arg3[%c0_11, %c0_12, %c0_13], %36 {strides = array<i32>} : memref<2x8x128xf32, #tpu.memory_space<vmem>>, vector<2x8x128xf32>,
    return
  }
  func.func @transform_0(%arg0: i32, %arg1: i32) -> (i32, i32, i32) {
    %c0_i32 = arith.constant 0 : i32
    %c0_i32_0 = arith.constant 0 : i32
    return %arg0, %c0_i32, %arg1 : i32, i32, i32
  }
  func.func @transform_1(%arg0: i32, %arg1: i32) -> (i32, i32, i32) {
    %c0_i32 = arith.constant 0 : i32
    %c0_i32_0 = arith.constant 0 : i32
    return %arg0, %c0_i32, %arg1 : i32, i32, i32
  }
}

</mosaic_0001>

<bundles_post_ra>
// kernel: tpu_custom_call.1
= control target key start
LH: loop header
LB: loop body
LE: loop exit
PB: predicated region body
PF: predicated region fallthrough
CT: control target
= control target key end

     0   :  { %6 = vsyncpa [#allocation3], 0  ;;  %s341_s0 = inlined_call_operand.hbm [shape: f32[2,8,128], index: 0, kind: input, shape index: {}]   ;;  %s342_s1 = inlined_call_operand.hbm [shape: f32[2,8,128], index: 1, kind: output, shape index: {}]  }
   0x1   :  { %7 = vsyncpa [#allocation4], 0  ;;  %s285_s6 = smov [#allocation2]  }
   0x2   :  { %s13_s7 = sshll.u32 %s285_s6, 4  ;;  %s14_s7 = int_to_ptr.vmem [resolvable:$true] %s13_s7 }
   0x3   :  { %s249_s8 = scalar_lea.vmem %s14_s7, 256  ;;  %p254_p1 = scmp.lt.s32.totalorder %s14_s7, %s14_s7 }
   0x4   :  { %p250_p0 = scmp.ne.s32.totalorder %s14_s7, %s249_s8  ;;  %p255_p2 = scmp.lt.s32.totalorder %s249_s8, %s249_s8 }
   0x6   :  { %p256_p3 = por %p255_p2, %p254_p1 }
   0x8   :  { %p257_p4 = pnand %p256_p3, %p250_p0 }
   0xa   :  { %260 = shalt.err (!%p257_p4)
}
   0xb   :  { %s286_s9 = smov 128   ;;  %s287_s10 = smov 8  }
   0xc   :  { %19 = dma.hbm_to_vmem [thread:$0]  %s341_s0, 256, %s14_s7, [#allocation3], %s286_s9, %s286_s9, %s287_s10  }
   0xd   :  { %281 = dma.done.wait [#allocation3], 256  }
   0xe   :  { %282 = vsyncadd [#allocation3], 4294967040  ;;  %v23_v0 = vld [vmem:[#allocation2] sm:$0xff]  ;;  %v24_v1 = vld [vmem:[#allocation2 + $0x8] sm:$0xff]  ;;  %vm39_vm0 = vcmask 1041409   ;;  %s288_s0 = smov 4   ;;  %v105_v39 = vlaneseq }
   0xf   :  { %v25_v2 = vrot.slane %v23_v0, 4  ;;  %v31_v3 = vrot.slane %v24_v1, 4  ;;  %s289_s13 = smov 16   ;;  %s290_s14 = smov 32  }
  0x10   :  { %s291_s15 = smov 64   ;;  %v106_v40 = vshrl.u32 %v105_v39, 7  ;;  %s292_s16 = smov [#allocation5]  }
  0x11   :  { %v26_v4 = vadd.f32 %v25_v2, %v23_v0  ;;  %v32_v5 = vadd.f32 %v31_v3, %v24_v1  ;;  %s217_s17 = sshll.u32 %s292_s16, 4  ;;  %s218_s17 = int_to_ptr.vmem [resolvable:$true] %s217_s17 }
  0x12   :  { %v319_v42 = vsub.s32 0, %v106_v40  ;;  %s261_s18 = scalar_lea.vmem %s218_s17, 256  ;;  %p266_p6 = scmp.lt.s32.totalorder %s218_s17, %s218_s17 }
  0x13   :  { %v27_v6 = vrot.slane %v26_v4, 2  ;;  %v33_v7 = vrot.slane %v32_v5, 2  ;;  %p262_p5 = scmp.ne.s32.totalorder %s218_s17, %s261_s18  ;;  %p267_p7 = scmp.lt.s32.totalorder %s261_s18, %s261_s18 }
  0x15   :  { %v28_v8 = vadd.f32 %v27_v6, %v26_v4  ;;  %v34_v9 = vadd.f32 %v33_v7, %v32_v5  ;;  %p268_p8 = por %p267_p7, %p266_p6 }
  0x17   :  { %v29_v10 = vrot.slane %v28_v8, 1  ;;  %v35_v11 = vrot.slane %v34_v9, 1  ;;  %p269_p9 = pnand %p268_p8, %p262_p5 }
  0x19   :  { %v30_v12 = vadd.f32 %v29_v10, %v28_v8  ;;  %v36_v13 = vadd.f32 %v35_v11, %v34_v9 }
  0x1b   :  { %v40_v14 = vsel %vm39_vm0, %v36_v13, %v30_v12 }
  0x1c   :  { %42 = vrot.lane.b32.xlu0 %v40_v14, %s288_s0 }
  0x8e   :  { %v43_v15 = vpop.permute.xlu0 %42 }
  0x8f   :  { %v45_v16 = vrot.slane %v43_v15, 1  ;;  %v48_v18 = vadd.f32 %v43_v15, %v30_v12 }
  0x91   :  { %v49_v17 = vadd.f32 %v45_v16, %v36_v13 }
  0x93   :  { %v52_v19 = vrot.slane %v49_v17, 7 }
  0x95   :  { %v53_v20 = vsel %vm39_vm0, %v52_v19, %v48_v18 }
  0x96   :  { %55 = vrot.lane.b32.xlu0 %v53_v20, %s287_s10 }
 0x108   :  { %v56_v21 = vpop.permute.xlu0 %55 }
 0x109   :  { %v58_v22 = vrot.slane %v56_v21, 1  ;;  %v61_v24 = vadd.f32 %v56_v21, %v48_v18 }
 0x10b   :  { %v62_v23 = vadd.f32 %v58_v22, %v49_v17 }
 0x10d   :  { %v65_v25 = vrot.slane %v62_v23, 7 }
 0x10f   :  { %v66_v26 = vsel %vm39_vm0, %v65_v25, %v61_v24 }
 0x110   :  { %68 = vrot.lane.b32.xlu1 %v66_v26, %s289_s13 }
 0x182   :  { %v69_v27 = vpop.permute.xlu1 %68 }
 0x183   :  { %v71_v28 = vrot.slane %v69_v27, 1  ;;  %v74_v30 = vadd.f32 %v69_v27, %v61_v24 }
 0x185   :  { %v75_v29 = vadd.f32 %v71_v28, %v62_v23 }
 0x187   :  { %v78_v31 = vrot.slane %v75_v29, 7 }
 0x189   :  { %v79_v32 = vsel %vm39_vm0, %v78_v31, %v74_v30 }
 0x18a   :  { %81 = vrot.lane.b32.xlu1 %v79_v32, %s290_s14 }
 0x1fc   :  { %v82_v33 = vpop.permute.xlu1 %81 }
 0x1fd   :  { %v84_v34 = vrot.slane %v82_v33, 1  ;;  %v87_v36 = vadd.f32 %v82_v33, %v74_v30 }
 0x1ff   :  { %v88_v35 = vadd.f32 %v84_v34, %v75_v29 }
 0x201   :  { %v91_v37 = vrot.slane %v88_v35, 7 }
 0x203   :  { %v92_v38 = vsel %vm39_vm0, %v91_v37, %v87_v36 }
 0x204   :  { %94 = vrot.lane.b32.xlu0 %v92_v38, %s291_s15 }
 0x276   :  { %v95_v41 = vpop.permute.xlu0 %94 }
 0x277   :  { %v97_v43 = vrot.slane %v95_v41, 1  ;;  %v100_v44 = vadd.f32 %v95_v41, %v87_v36 }
 0x279   :  { %v101_v45 = vadd.f32 %v97_v43, %v88_v35  ;;  %v103_v46 = vmul.f32 0.00390625, %v100_v44 }
 0x27b   :  { %v104_v47 = vmul.f32 0.00390625, %v101_v45  ;;  %v108_v48 = vrot.slane %v103_v46, %v319_v42 }
 0x27d   :  { %v112_v49 = vrot.slane %v104_v47, %v319_v42  ;;  %v113_v50 = vsub.f32 %v23_v0, %v108_v48 }
 0x27f   :  { %v114_v51 = vsub.f32 %v24_v1, %v112_v49  ;;  %v115_v52 = vmul.f32 %v113_v50, %v113_v50 }
 0x281   :  { %v116_v53 = vmul.f32 %v114_v51, %v114_v51  ;;  %v117_v54 = vrot.slane %v115_v52, 4 }
 0x283   :  { %v118_v55 = vadd.f32 %v117_v54, %v115_v52  ;;  %v123_v56 = vrot.slane %v116_v53, 4 }
 0x285   :  { %v119_v57 = vrot.slane %v118_v55, 2  ;;  %v124_v58 = vadd.f32 %v123_v56, %v116_v53 }
 0x287   :  { %v120_v59 = vadd.f32 %v119_v57, %v118_v55  ;;  %v125_v60 = vrot.slane %v124_v58, 2 }
 0x289   :  { %v121_v61 = vrot.slane %v120_v59, 1  ;;  %v126_v62 = vadd.f32 %v125_v60, %v124_v58 }
 0x28b   :  { %v127_v63 = vrot.slane %v126_v62, 1  ;;  %v122_v2 = vadd.f32 %v121_v61, %v120_v59 }
 0x28d   :  { %v128_v3 = vadd.f32 %v127_v63, %v126_v62 }
 0x28f   :  { %v131_v4 = vsel %vm39_vm0, %v128_v3, %v122_v2 }
 0x290   :  { %133 = vrot.lane.b32.xlu1 %v131_v4, %s288_s0 }
 0x302   :  { %v134_v0 = vpop.permute.xlu1 %133 }
 0x303   :  { %v136_v1 = vrot.slane %v134_v0, 1  ;;  %v139_v6 = vadd.f32 %v134_v0, %v122_v2 }
 0x305   :  { %v140_v5 = vadd.f32 %v136_v1, %v128_v3 }
 0x307   :  { %v143_v7 = vrot.slane %v140_v5, 7 }
 0x309   :  { %v144_v8 = vsel %vm39_vm0, %v143_v7, %v139_v6 }
 0x30a   :  { %146 = vrot.lane.b32.xlu0 %v144_v8, %s287_s10 }
 0x37c   :  { %v147_v9 = vpop.permute.xlu0 %146 }
 0x37d   :  { %v149_v10 = vrot.slane %v147_v9, 1  ;;  %v152_v12 = vadd.f32 %v147_v9, %v139_v6 }
 0x37f   :  { %v153_v11 = vadd.f32 %v149_v10, %v140_v5 }
 0x381   :  { %v156_v13 = vrot.slane %v153_v11, 7 }
 0x383   :  { %v157_v14 = vsel %vm39_vm0, %v156_v13, %v152_v12 }
 0x384   :  { %159 = vrot.lane.b32.xlu1 %v157_v14, %s289_s13 }
 0x3f6   :  { %v160_v15 = vpop.permute.xlu1 %159 }
 0x3f7   :  { %v162_v16 = vrot.slane %v160_v15, 1  ;;  %v165_v18 = vadd.f32 %v160_v15, %v152_v12 }
 0x3f9   :  { %v166_v17 = vadd.f32 %v162_v16, %v153_v11 }
 0x3fb   :  { %v169_v19 = vrot.slane %v166_v17, 7 }
 0x3fd   :  { %v170_v20 = vsel %vm39_vm0, %v169_v19, %v165_v18 }
 0x3fe   :  { %172 = vrot.lane.b32.xlu0 %v170_v20, %s290_s14 }
 0x470   :  { %v173_v21 = vpop.permute.xlu0 %172 }
 0x471   :  { %v175_v22 = vrot.slane %v173_v21, 1  ;;  %v178_v24 = vadd.f32 %v173_v21, %v165_v18 }
 0x473   :  { %v179_v23 = vadd.f32 %v175_v22, %v166_v17 }
 0x475   :  { %v182_v25 = vrot.slane %v179_v23, 7 }
 0x477   :  { %v183_v26 = vsel %vm39_vm0, %v182_v25, %v178_v24 }
 0x478   :  { %185 = vrot.lane.b32.xlu1 %v183_v26, %s291_s15 }
 0x4ea   :  { %v186_v27 = vpop.permute.xlu1 %185 }
 0x4eb   :  { %v188_v28 = vrot.slane %v186_v27, 1  ;;  %v191_v29 = vadd.f32 %v186_v27, %v178_v24 }
 0x4ed   :  { %v192_v30 = vadd.f32 %v188_v28, %v179_v23  ;;  %v194_v31 = vmul.f32 0.003921569, %v191_v29 }
 0x4ef   :  { %v195_v32 = vmul.f32 0.003921569, %v192_v30  ;;  %237 = vrsqrt.f32 %v194_v31 }
 0x4f1   :  { %239 = vrsqrt.f32 %v195_v32 }
 0x4fc   :  { %v238_v33 = vpop.eup %237 }
 0x4fd   :  { %v198_v34 = vmin.f32 %v238_v33, 100000.0 }
 0x4fe   :  { %v240_v35 = vpop.eup %239 }
 0x4ff   :  { %v199_v36 = vmin.f32 %v240_v35, 100000.0  ;;  %v203_v37 = vrot.slane %v198_v34, %v319_v42 }
 0x501   :  { %v207_v38 = vrot.slane %v199_v36, %v319_v42  ;;  %v208_v39 = vmul.f32 %v203_v37, %v113_v50 }
 0x503   :  { %v209_v40 = vmul.f32 %v207_v38, %v114_v51  ;;  %210 = vst [vmem:[#allocation5] sm:$0xff] %v208_v39 }
 0x505   :  { %211 = vst [vmem:[#allocation5 + $0x8] sm:$0xff] %v209_v40 }
 0x506   :  { %272 = shalt.err (!%p269_p9)
}
 0x507   :  { %223 = dma.vmem_to_hbm [thread:$0]  %s218_s17, 256, %s342_s1, [#allocation4], %s286_s9, %s286_s9, %s287_s10  }
 0x508   :  { %283 = dma.done.wait [#allocation4], 256  }
 0x509   :  { %284 = vsyncadd [#allocation4], 4294967040 }
 0x50a   :  { %227 = vsyncpa [#allocation3], 1 }
 0x50b   :  { %228 = vsyncpa [#allocation4], 1 }

</bundles_post_ra>
